<compile_context>
chip_gen: v7x
topology: tpu7x:2x2x1
jax: 0.10.0
libtpu: 0.0.40
codegen_flags: <defaults>
</compile_context>

<pallas_src>
import jax
import jax.numpy as jnp
from jax.experimental import pallas as pl
from jax.experimental.pallas import tpu as pltpu


def _mlp_kernel(x_ref,
                w1_ref, b1_ref,
                w2_ref, b2_ref,
                w3_ref, b3_ref,
                w4_ref, b4_ref,
                o_ref):
    # x_ref: (input_size, TB) -- batch on the lane axis.
    # wK_ref: (out_features, in_features) ; bK_ref: (out_features, 1).
    x = x_ref[...]

    h = jnp.dot(w1_ref[...], x, preferred_element_type=jnp.float32) + b1_ref[...]
    h = jnp.maximum(h, 0.0)

    h = jnp.dot(w2_ref[...], h, preferred_element_type=jnp.float32) + b2_ref[...]
    h = jnp.maximum(h, 0.0)

    h = jnp.dot(w3_ref[...], h, preferred_element_type=jnp.float32) + b3_ref[...]
    h = jnp.maximum(h, 0.0)

    out = jnp.dot(w4_ref[...], h, preferred_element_type=jnp.float32) + b4_ref[...]
    o_ref[...] = out.astype(o_ref.dtype)


def _pick_batch_tile(B, tb):
    """Pick a batch tile TB that (a) divides B and (b) is a multiple of 128,
    unless B itself is small/unaligned, in which case TB == B (full block)."""
    if B % 128 == 0:
        tb = max(128, (min(tb, B) // 128) * 128)
        while B % tb != 0:
            tb -= 128
        return tb
    # Unaligned / tiny batch: single full-extent block (block dim == array dim).
    return B


def feedforward_net3r(x, params, *, tb=512):
    """x: (B, input_size) f32.
    params: PyTorch-layout weights wK (out, in) and biases bK (out, 1)."""
    B, input_size = x.shape
    num_classes = params["w4"].shape[0]

    TB = _pick_batch_tile(B, tb)
    grid = (B // TB,)

    # Batch on the lane axis.  (Transpose is a cheap XLA op outside the kernel.)
    x_t = jnp.transpose(x)  # (input_size, B)

    def batch_tile_map(i):          # x / out: walk the batch (lane) axis
        return (0, i)

    def resident_map(i):            # weights / biases: constant block -> stay in VMEM
        return (0, 0)

    in_specs = [
        pl.BlockSpec((input_size, TB), batch_tile_map),
        pl.BlockSpec(params["w1"].shape, resident_map),
        pl.BlockSpec(params["b1"].shape, resident_map),
        pl.BlockSpec(params["w2"].shape, resident_map),
        pl.BlockSpec(params["b2"].shape, resident_map),
        pl.BlockSpec(params["w3"].shape, resident_map),
        pl.BlockSpec(params["b3"].shape, resident_map),
        pl.BlockSpec(params["w4"].shape, resident_map),
        pl.BlockSpec(params["b4"].shape, resident_map),
    ]

    out_t = pl.pallas_call(
        _mlp_kernel,
        out_shape=jax.ShapeDtypeStruct((num_classes, B), jnp.float32),
        grid=grid,
        in_specs=in_specs,
        out_specs=pl.BlockSpec((num_classes, TB), batch_tile_map),
        compiler_params=pltpu.CompilerParams(
            dimension_semantics=("parallel",)),
    )(x_t,
      params["w1"], params["b1"],
      params["w2"], params["b2"],
      params["w3"], params["b3"],
      params["w4"], params["b4"])

    return jnp.transpose(out_t)  # (B, num_classes)


def init_params(key, input_size, hidden_size, num_classes):
    """Deterministic PyTorch-like init: U(-1/sqrt(fan_in), 1/sqrt(fan_in)).
    Weights stored in native PyTorch layout (out_features, in_features);
    biases as (out_features, 1) columns (broadcast over the batch/lane axis)."""
    dims = [(input_size, hidden_size),
            (hidden_size, hidden_size),
            (hidden_size, hidden_size),
            (hidden_size, num_classes)]
    params = {}
    keys = jax.random.split(key, 2 * len(dims))
    for i, (fan_in, fan_out) in enumerate(dims):
        bound = 1.0 / jnp.sqrt(jnp.float32(fan_in))
        w = jax.random.uniform(keys[2 * i], (fan_out, fan_in),
                               minval=-bound, maxval=bound, dtype=jnp.float32)
        b = jax.random.uniform(keys[2 * i + 1], (fan_out, 1),
                               minval=-bound, maxval=bound, dtype=jnp.float32)
        params[f"w{i+1}"] = w
        params[f"b{i+1}"] = b
    return params


if __name__ == "__main__":
    input_size, hidden_size, num_classes = 16, 32, 8
    batch = 256            # small, but enough to exercise a multi-step grid
    tile = 128             # -> grid = (2,): pipelined, lane-dense batch tiles

    key = jax.random.PRNGKey(0)
    kx, kp = jax.random.split(key)
    x = jax.random.normal(kx, (batch, input_size), dtype=jnp.float32)
    params = init_params(kp, input_size, hidden_size, num_classes)

    out = feedforward_net3r(x, params, tb=tile)
    jax.block_until_ready(out)

    # Plain-JAX reference (same math, batch-major) for sanity.
    h = jnp.maximum(x @ params["w1"].T + params["b1"].T, 0.0)
    h = jnp.maximum(h @ params["w2"].T + params["b2"].T, 0.0)
    h = jnp.maximum(h @ params["w3"].T + params["b3"].T, 0.0)
    ref = h @ params["w4"].T + params["b4"].T

    assert out.shape == (batch, num_classes)
    assert jnp.allclose(out, ref, atol=1e-4, rtol=1e-4)

    print("KERNEL_OK")
</pallas_src>

<mosaic_0001>
module attributes {stable_mosaic.version = 11 : i64} {
  func.func @_mlp_kernel(%arg0: i32, %arg1: memref<16x128xf32, #tpu.memory_space<vmem>>, %arg2: memref<32x16xf32, #tpu.memory_space<vmem>>, %arg3: memref<32x1xf32, #tpu.memory_space<vmem>>, %arg4: memref<32x32xf32, #tpu.memory_space<vmem>>, %arg5: memref<32x1xf32, #tpu.memory_space<vmem>>, %arg6: memref<32x32xf32, #tpu.memory_space<vmem>>, %arg7: memref<32x1xf32, #tpu.memory_space<vmem>>, %arg8: memref<8x32xf32, #tpu.memory_space<vmem>>, %arg9: memref<8x1xf32, #tpu.memory_space<vmem>>, %arg10: memref<8x128xf32, #tpu.memory_space<vmem>>) attributes {dimension_semantics = [#tpu.dimension_semantics<parallel>], iteration_bounds = array<i64: 2>, scalar_prefetch = 0 : i64, scratch_operands = 0 : i64, tpu.core_type = #tpu.core_type<tc>, window_params = [{transform_indices = @transform_0, window_bounds = array<i64: 16, 128>}, {pipeline_mode = #tpu.pipeline_mode<synchronous>, transform_indices = @transform_1, window_bounds = array<i64: 32, 16>}, {pipeline_mode = #tpu.pipeline_mode<synchronous>, transform_indices = @transform_2, window_bounds = array<i64: 32, 1>}, {pipeline_mode = #tpu.pipeline_mode<synchronous>, transform_indices = @transform_3, window_bounds = array<i64: 32, 32>}, {pipeline_mode = #tpu.pipeline_mode<synchronous>, transform_indices = @transform_4, window_bounds = array<i64: 32, 1>}, {pipeline_mode = #tpu.pipeline_mode<synchronous>, transform_indices = @transform_5, window_bounds = array<i64: 32, 32>}, {pipeline_mode = #tpu.pipeline_mode<synchronous>, transform_indices = @transform_6, window_bounds = array<i64: 32, 1>}, {pipeline_mode = #tpu.pipeline_mode<synchronous>, transform_indices = @transform_7, window_bounds = array<i64: 8, 32>}, {pipeline_mode = #tpu.pipeline_mode<synchronous>, transform_indices = @transform_8, window_bounds = array<i64: 8, 1>}, {transform_indices = @transform_9, window_bounds = array<i64: 8, 128>}]} {
    %c0 = arith.constant 0 : index
    %c0_0 = arith.constant 0 : index
    %0 = vector.load %arg1[%c0, %c0_0] : memref<16x128xf32, #tpu.memory_space<vmem>>, vector<16x128xf32>
    %c0_1 = arith.constant 0 : index
    %c0_2 = arith.constant 0 : index
    %1 = vector.load %arg2[%c0_1, %c0_2] : memref<32x16xf32, #tpu.memory_space<vmem>>, vector<32x16xf32>
    %cst = arith.constant dense<0.000000e+00> : vector<32x128xf32>
    %2 = tpu.matmul %1, %0, %cst {dimension_numbers = #tpu.dot_dimension_numbers<[1], [0], [0], [1], [0, 0, 1, 1], [], []>} : vector<32x16xf32>, vector<16x128xf32>, vector<32x128xf32> -> vector<32x128xf32>
    %c0_3 = arith.constant 0 : index
    %c0_4 = arith.constant 0 : index
    %3 = vector.load %arg3[%c0_3, %c0_4] : memref<32x1xf32, #tpu.memory_space<vmem>>, vector<32x1xf32>
    %4 = vector.broadcast %3 : vector<32x1xf32> to vector<32x128xf32>
    %5 = arith.addf %2, %4 : vector<32x128xf32>
    %cst_5 = arith.constant 0.000000e+00 : f32
    %6 = vector.broadcast %cst_5 : f32 to vector<32x128xf32>
    %7 = arith.maximumf %5, %6 : vector<32x128xf32>
    %c0_6 = arith.constant 0 : index
    %c0_7 = arith.constant 0 : index
    %8 = vector.load %arg4[%c0_6, %c0_7] : memref<32x32xf32, #tpu.memory_space<vmem>>, vector<32x32xf32>
    %cst_8 = arith.constant dense<0.000000e+00> : vector<32x128xf32>
    %9 = tpu.matmul %8, %7, %cst_8 {dimension_numbers = #tpu.dot_dimension_numbers<[1], [0], [0], [1], [0, 0, 1, 1], [], []>} : vector<32x32xf32>, vector<32x128xf32>, vector<32x128xf32> -> vector<32x128xf32>
    %c0_9 = arith.constant 0 : index
    %c0_10 = arith.constant 0 : index
    %10 = vector.load %arg5[%c0_9, %c0_10] : memref<32x1xf32, #tpu.memory_space<vmem>>, vector<32x1xf32>
    %11 = vector.broadcast %10 : vector<32x1xf32> to vector<32x128xf32>
    %12 = arith.addf %9, %11 : vector<32x128xf32>
    %cst_11 = arith.constant 0.000000e+00 : f32
    %13 = vector.broadcast %cst_11 : f32 to vector<32x128xf32>
    %14 = arith.maximumf %12, %13 : vector<32x128xf32>
    %c0_12 = arith.constant 0 : index
    %c0_13 = arith.constant 0 : index
    %15 = vector.load %arg6[%c0_12, %c0_13] : memref<32x32xf32, #tpu.memory_space<vmem>>, vector<32x32xf32>
    %cst_14 = arith.constant dense<0.000000e+00> : vector<32x128xf32>
    %16 = tpu.matmul %15, %14, %cst_14 {dimension_numbers = #tpu.dot_dimension_numbers<[1], [0], [0], [1], [0, 0, 1, 1], [], []>} : vector<32x32xf32>, vector<32x128xf32>, vector<32x128xf32> -> vector<32x128xf32>
    %c0_15 = arith.constant 0 : index
    %c0_16 = arith.constant 0 : index
    %17 = vector.load %arg7[%c0_15, %c0_16] : memref<32x1xf32, #tpu.memory_space<vmem>>, vector<32x1xf32>
    %18 = vector.broadcast %17 : vector<32x1xf32> to vector<32x128xf32>
    %19 = arith.addf %16, %18 : vector<32x128xf32>
    %cst_17 = arith.constant 0.000000e+00 : f32
    %20 = vector.broadcast %cst_17 : f32 to vector<32x128xf32>
    %21 = arith.maximumf %19, %20 : vector<32x128xf32>
    %c0_18 = arith.constant 0 : index
    %c0_19 = arith.constant 0 : index
    %22 = vector.load %arg8[%c0_18, %c0_19] : memref<8x32xf32, #tpu.memory_space<vmem>>, vector<8x32xf32>
    %cst_20 = arith.constant dense<0.000000e+00> : vector<8x128xf32>
    %23 = tpu.matmul %22, %21, %cst_20 {dimension_numbers = #tpu.dot_dimension_numbers<[1], [0], [0], [1], [0, 0, 1, 1], [], []>} : vector<8x32xf32>, vector<32x128xf32>, vector<8x128xf32> -> vector<8x128xf32>
    %c0_21 = arith.constant 0 : index
    %c0_22 = arith.constant 0 : index
    %24 = vector.load %arg9[%c0_21, %c0_22] : memref<8x1xf32, #tpu.memory_space<vmem>>, vector<8x1xf32>
    %25 = vector.broadcast %24 : vector<8x1xf32> to vector<8x128xf32>
    %26 = arith.addf %23, %25 : vector<8x128xf32>
    %c0_23 = arith.constant 0 : index
    %c0_24 = arith.constant 0 : index
    %27 = vector.load %arg10[%c0_23, %c0_24] : memref<8x128xf32, #tpu.memory_space<vmem>>, vector<8x128xf32>
    tpu.vector_store %arg10[%c0_23, %c0_24], %26 {strides = array<i32>} : memref<8x128xf32, #tpu.memory_space<vmem>>, vector<8x128xf32>,
    return
  }
  func.func @transform_0(%arg0: i32) -> (i32, i32) {
    %c0_i32 = arith.constant 0 : i32
    %c0_i32_0 = arith.constant 0 : i32
    return %c0_i32, %arg0 : i32, i32
  }
  func.func @transform_1(%arg0: i32) -> (i32, i32) {
    %c0_i32 = arith.constant 0 : i32
    %c0_i32_0 = arith.constant 0 : i32
    %c0_i32_1 = arith.constant 0 : i32
    return %c0_i32, %c0_i32_0 : i32, i32
  }
  func.func @transform_2(%arg0: i32) -> (i32, i32) {
    %c0_i32 = arith.constant 0 : i32
    %c0_i32_0 = arith.constant 0 : i32
    %c0_i32_1 = arith.constant 0 : i32
    return %c0_i32, %c0_i32_0 : i32, i32
  }
  func.func @transform_3(%arg0: i32) -> (i32, i32) {
    %c0_i32 = arith.constant 0 : i32
    %c0_i32_0 = arith.constant 0 : i32
    %c0_i32_1 = arith.constant 0 : i32
    return %c0_i32, %c0_i32_0 : i32, i32
  }
  func.func @transform_4(%arg0: i32) -> (i32, i32) {
    %c0_i32 = arith.constant 0 : i32
    %c0_i32_0 = arith.constant 0 : i32
    %c0_i32_1 = arith.constant 0 : i32
    return %c0_i32, %c0_i32_0 : i32, i32
  }
  func.func @transform_5(%arg0: i32) -> (i32, i32) {
    %c0_i32 = arith.constant 0 : i32
    %c0_i32_0 = arith.constant 0 : i32
    %c0_i32_1 = arith.constant 0 : i32
    return %c0_i32, %c0_i32_0 : i32, i32
  }
  func.func @transform_6(%arg0: i32) -> (i32, i32) {
    %c0_i32 = arith.constant 0 : i32
    %c0_i32_0 = arith.constant 0 : i32
    %c0_i32_1 = arith.constant 0 : i32
    return %c0_i32, %c0_i32_0 : i32, i32
  }
  func.func @transform_7(%arg0: i32) -> (i32, i32) {
    %c0_i32 = arith.constant 0 : i32
    %c0_i32_0 = arith.constant 0 : i32
    %c0_i32_1 = arith.constant 0 : i32
    return %c0_i32, %c0_i32_0 : i32, i32
  }
  func.func @transform_8(%arg0: i32) -> (i32, i32) {
    %c0_i32 = arith.constant 0 : i32
    %c0_i32_0 = arith.constant 0 : i32
    %c0_i32_1 = arith.constant 0 : i32
    return %c0_i32, %c0_i32_0 : i32, i32
  }
  func.func @transform_9(%arg0: i32) -> (i32, i32) {
    %c0_i32 = arith.constant 0 : i32
    %c0_i32_0 = arith.constant 0 : i32
    return %c0_i32, %arg0 : i32, i32
  }
}

</mosaic_0001>

<bundles_post_ra>
// kernel: tpu_custom_call.1
= control target key start
LH: loop header
LB: loop body
LE: loop exit
PB: predicated region body
PF: predicated region fallthrough
CT: control target
= control target key end

     0   :  { %14 = vsyncpa [#allocation4], 0  ;;  %s1412_s0 = inlined_call_operand.vmem [shape: f32[16,256], index: 0, kind: input, shape index: {}]   ;;  %s1413_s1 = inlined_call_operand.vmem [shape: f32[32,16], index: 1, kind: input, shape index: {}]   ;;  %s1414_s2 = inlined_call_operand.vmem [shape: f32[32,1], index: 2, kind: input, shape index: {}]   ;;  %s1415_s3 = inlined_call_operand.vmem [shape: f32[32,32], index: 3, kind: input, shape index: {}]   ;;  %s1416_s4 = inlined_call_operand.vmem [shape: f32[32,1], index: 4, kind: input, shape index: {}]   ;;  %s1417_s5 = inlined_call_operand.vmem [shape: f32[32,32], index: 5, kind: input, shape index: {}]   ;;  %s1418_s6 = inlined_call_operand.vmem [shape: f32[32,1], index: 6, kind: input, shape index: {}]   ;;  %s1419_s7 = inlined_call_operand.vmem [shape: f32[8,32], index: 7, kind: input, shape index: {}]   ;;  %s1420_s8 = inlined_call_operand.vmem [shape: f32[8,1], index: 8, kind: input, shape index: {}]   ;;  %s1421_s9 = inlined_call_operand.hbm [shape: f32[8,256], index: 9, kind: output, shape index: {}]  }
   0x1   :  { %16 = vsyncpa [#allocation4 + $0x1], 0  ;;  %s1211_s30 = smov 0   ;;  %s1213_s10 = smov 0  }
   0x2   :  { %s1215_s11 = smov 0   ;;  %s1217_s12 = smov 0  }
   0x3 LB: > { %s919_s13 = sadd.s32 4294967295, %s1154_s12   ;;  %s920_s14 = sadd.s32 4294967294, %s1154_s12   ;;  %s1154_s12 = sphi %s1217_s12, %s1427_s12   ;;  %s1150_s11 = sphi %s1215_s11, %s1426_s11   ;;  %s1146_s10 = sphi %s1213_s10, %s1425_s10   ;;  %s1142_s30 = sphi %s1211_s30, %s1424_s30  }
   0x4   : > { %s1234_s15 = sadd.s32 1, %s1154_s12   ;;  %s29_s16 = sadd.s32 1, %s1150_s11 }
   0x5   : > { %s26_s17 = ssub.s32 %s1154_s12, %s1234_s15  ;;  %p36_p0 = scmp.ne.s32.totalorder %s1150_s11, %s1146_s10 }
   0x6   : > { %p27_p1 = scmp.eq.s32.totalorder %s26_s17, 0  ;;  %p37_p2 = scmp.eq.s32.totalorder %s1154_s12, 0 }
   0x7   : > { %p234_p3 = scmp.eq.s32.totalorder %s919_s13, 1  ;;  %p239_p4 = scmp.ne.s32.totalorder %s1146_s10, %s1142_s30 }
   0x8   : > { %s1247_s18 = scalar_select %p27_p1, %s1150_s11, %s29_s16  }
   0x9   : > { %p38_p5 = por %p37_p2, %p36_p0  ;;  %p1249_p6 = por %p234_p3, %p36_p0 }
   0xa   : > { %p240_p7 = scmp.eq.s32.totalorder %s920_s14, 1  ;;  %p922_p9 = scmp.ge.s32.totalorder %s1154_s12, 2 }
   0xc   : > { %p1253_p8 = por %p240_p7, %p239_p4  ;;  %280 = sbr.rel (%p922_p9) target bundleno = 26 (0x1a), region = 48 }
  0x13   : > { %283 = sbr.rel (!%p38_p5) target bundleno = 26 (0x1a), region = 52  ;;  %s285_s21 = sand.u32 (%p38_p5), 1, %s1150_s11  }
  0x14   : > { %s924_s22 = sshll.u32 (%p38_p5), %s1154_s12, 3  ;;  %s923_s23 = sshll.u32 (%p38_p5), %s285_s21, 4 }
  0x15   : > { %s289_s26 = scalar_lea.vmem (%p38_p5), %s1412_s0, %s924_s22  ;;  %s287_s27 = scalar_lea.vmem (%p38_p5), [#allocation2], %s923_s23 }
  0x16   : > { %v319_v0 = vld [vmem:[%s289_s26] sm:$0xff] (%p38_p5)  ;;  %v321_v1 = vld [vmem:[%s289_s26 + $0x10] sm:$0xff] (%p38_p5) }
  0x17   : > { %320 = vst [vmem:[%s287_s27] sm:$0xff] (%p38_p5), %v319_v0  ;;  %322 = vst [vmem:[%s287_s27 + $0x8] sm:$0xff] (%p38_p5), %v321_v1 }
  0x1a PF: > { %p925_p10 = scmp.ge.s32.totalorder %s1154_s12, 1  ;;  %p327_p11 = scmp.lt.s32.totalorder %s1154_s12, 3 }
  0x1c   : > { %p328_p12 = pnand %p925_p10, %p327_p11 }
  0x1d   : > { %s1268_s28 = sand.u32 (!%p328_p12), 1, %s1146_s10   ;;  %v371_v2 = vld [vmem:[%s1413_s1] sm:$0xff] (!%p328_p12)  ;;  %vm399_vm0 = vcmask (!%p328_p12), 130048   ;;  %v1156_v3 = vmov (!%p328_p12), 0   ;;  %v377_v5 = vld [vmem:[%s1414_s2 + $0x10] sm:$0xff] (!%p328_p12)  ;;  %v376_v8 = vld [vmem:[%s1414_s2 + $0x8] sm:$0xff] (!%p328_p12) }
  0x1e   : > { %331 = sbr.rel (%p328_p12) target bundleno = 947 (0x3b3), region = 90  ;;  %s926_s16 = sshll.u32 (!%p328_p12), %s1268_s28, 4  ;;  %976 = vmatprep.mubr.msk.f32.mxu0 (!%p328_p12), %vm399_vm0, %v371_v2  ;;  %1090 = vset.pattern.permute.xlu0 (!%p328_p12), %v1156_v3  ;;  %v375_v4 = vld [vmem:[%s1414_s2] sm:$0xff] (!%p328_p12)  ;;  %v378_v10 = vld [vmem:[%s1414_s2 + $0x18] sm:$0xff] (!%p328_p12)  ;;  %v372_v11 = vld [vmem:[%s1413_s1 + $0x8] sm:$0xff] (!%p328_p12)  ;;  %vm529_vm1 = vcmask (!%p328_p12), 261120  }
  0x1f   : > { %381 = vperm.xlu0 (!%p328_p12), %1090, %v375_v4   ;;  %1091 = vset.pattern.permute.xlu1 (!%p328_p12), %v1156_v3  ;;  %s336_s24 = scalar_lea.vmem (!%p328_p12), [#allocation2], %s926_s16  ;;  %v505_v12 = vld [vmem:[%s1416_s4] sm:$0xff] (!%p328_p12)  ;;  %v373_v13 = vld [vmem:[%s1413_s1 + $0x10] sm:$0xff] (!%p328_p12)  ;;  %v506_v14 = vld [vmem:[%s1416_s4 + $0x8] sm:$0xff] (!%p328_p12)  ;;  %v1157_v3 = vmov (!%p328_p12), 0.0|0.0   ;;  %vm1158_vm2 = vmmov (!%p328_p12), 0  }
  0x20   : > { %v369_v6 = vld [vmem:[%s336_s24] sm:$0xff] (!%p328_p12)  ;;  %v370_v7 = vld [vmem:[%s336_s24 + $0x8] sm:$0xff] (!%p328_p12)  ;;  %391 = vperm.xlu1 (!%p328_p12), %1091, %v377_v5   ;;  %v1159_v4 = vmov (!%p328_p12), 0.0   ;;  %s927_s27 = sshll.u32 (!%p328_p12), %s1268_s28, 3  ;;  %s942_s29 = sshll.u32 (!%p328_p12), %s919_s13, 7 }
  0x21   : > { %v1021_v9 = vpack.c.bf16 (!%p328_p12), %v370_v7, %v369_v6  ;;  %v374_v15 = vld [vmem:[%s1413_s1 + $0x18] sm:$0xff] (!%p328_p12)  ;;  %v507_v16 = vld [vmem:[%s1416_s4 + $0x10] sm:$0xff] (!%p328_p12)  ;;  %v635_v18 = vld [vmem:[%s1418_s6] sm:$0xff] (!%p328_p12)  ;;  %s368_s14 = scalar_lea.vmem (!%p328_p12), [#allocation3], %s927_s27  ;;  %s1368_s22 = scalar_lea.hbm (!%p328_p12), %s1421_s9, %s942_s29 }
  0x22   : > { %v508_v17 = vld [vmem:[%s1416_s4 + $0x18] sm:$0xff] (!%p328_p12)  ;;  %v636_v19 = vld [vmem:[%s1418_s6 + $0x8] sm:$0xff] (!%p328_p12)  ;;  %v637_v20 = vld [vmem:[%s1418_s6 + $0x10] sm:$0xff] (!%p328_p12)  ;;  %s855_s17 = sshll.u32 (!%p328_p12), %s368_s14, 4  ;;  %s842_s23 = scalar_lea.sflag (!%p328_p12), [#allocation4], %s1268_s28  ;;  %s1370_s17 = int_to_ptr.vmem [resolvable:$true] %s855_s17 }
  0x23   : > { %1022 = vmatprep.subr.bf16.mxu0 (!%p328_p12), %v1021_v9  ;;  %386 = vperm.xlu0 (!%p328_p12), %1090, %v376_v8   ;;  %v638_v21 = vld [vmem:[%s1418_s6 + $0x18] sm:$0xff] (!%p328_p12)  ;;  %v761_v22 = vld [vmem:[%s1420_s8] sm:$0xff] (!%p328_p12)  ;;  %v502_v42 = vld [vmem:[%s1415_s3 + $0x8] sm:$0xff] (!%p328_p12)  ;;  %s1092_s24 = scalar_lea.vmem (!%p328_p12), %s1370_s17, 128  ;;  %s1160_s13 = smov (!%p328_p12), [#allocation3]  }
  0x24   : > { %1024 = vmatpush3.bf16.msra.mxu0 (!%p328_p12), %v1021_v9  ;;  %396 = vperm.xlu1 (!%p328_p12), %1091, %v378_v10   ;;  %v501_v23 = vld [vmem:[%s1415_s3] sm:$0xff] (!%p328_p12)  ;;  %v503_v43 = vld [vmem:[%s1415_s3 + $0x10] sm:$0xff] (!%p328_p12)  ;;  %v504_v44 = vld [vmem:[%s1415_s3 + $0x18] sm:$0xff] (!%p328_p12)  ;;  %p1093_p13 = scmp.ne.s32.totalorder (!%p328_p12), %s1370_s17, %s1092_s24  ;;  %s1096_s25 = sshll.u32 (!%p328_p12), %s1160_s13, 4  ;;  %s1097_s25 = int_to_ptr.vmem [resolvable:$false] %s1096_s25 }
  0x25   : > { %990 = vmatprep.mubr.msk.f32.mxu1 %vm529_vm1, %v501_v23  ;;  %v631_v45 = vld [vmem:[%s1417_s5] sm:$0xff]  ;;  %v632_v0 = vld [vmem:[%s1417_s5 + $0x8] sm:$0xff]  ;;  %v633_v1 = vld [vmem:[%s1417_s5 + $0x10] sm:$0xff]  ;;  %s1098_s26 = scalar_lea.vmem %s1097_s25, 256  ;;  %p1099_p2 = scmp.lt.s32.totalorder %s1370_s17, %s1097_s25 }
  0x26   : > { %v634_v2 = vld [vmem:[%s1417_s5 + $0x18] sm:$0xff]  ;;  %v760_v23 = vld [vmem:[%s1419_s7] sm:$0xff]  ;;  %p1094_p0 = pnand %p1093_p13, %p1249_p6  ;;  %p1100_p3 = scmp.lt.s32.totalorder %s1098_s26, %s1092_s24 }
  0x27   : > { %977 = vmatmul.mubr.msk.f32.vlgmr.msra.gmra.mrb[0].mxu0 %vm399_vm0, %v372_v11  ;;  %511 = vperm.xlu0 %1090, %v505_v12  }
  0x28   : > { %979 = vmatprep.mubr.msk.f32.mxu0 %vm399_vm0, %v373_v13  ;;  %516 = vperm.xlu1 %1091, %v506_v14   ;;  %p1095_p1 = pneg %p1094_p0  ;;  %p1101_p4 = por %p1100_p3, %p1099_p2 }
  0x2a   : > { %p1102_p5 = pnand %p1101_p4, %p1095_p1 }
  0x2b   : > { %980 = vmatmul.mubr.msk.f32.gmra.mrb[2].mxu0 %vm399_vm0, %v374_v15  ;;  %521 = vperm.xlu0 %1090, %v507_v16  }
  0x2c   : > { %526 = vperm.xlu1 %1091, %v508_v17   ;;  %1004 = vmatprep.mubr.msk.f32.mxu0 %vm529_vm1, %v631_v45 }
  0x2f   : > { %641 = vperm.xlu0 %1090, %v635_v18  }
  0x30   : > { %646 = vperm.xlu1 %1091, %v636_v19  }
  0x33   : > { %651 = vperm.xlu0 %1090, %v637_v20  }
  0x34   : > { %656 = vperm.xlu1 %1091, %v638_v21  }
  0x37   : > { %764 = vperm.xlu0 %1090, %v761_v22  }
  0x9e   : > { %v382_v24 = vpop.permute.xlu0 %381 }
  0x9f   : > { %v392_v25 = vpop.permute.xlu1 %391 }
  0xa2   : > { %v387_v26 = vpop.permute.xlu0 %386 }
  0xa3   : > { %v397_v32 = vpop.permute.xlu1 %396 }
  0xa6   : > { %v512_v47 = vpop.permute.xlu0 %511 }
  0xa7   : > { %v517_v46 = vpop.permute.xlu1 %516 }
  0xaa   : > { %v522_v56 = vpop.permute.xlu0 %521 }
  0xab   : > { %v527_v53 = vpop.permute.xlu1 %526 }
  0xae   : > { %v642_v6 = vpop.permute.xlu0 %641 }
  0xaf   : > { %v647_v5 = vpop.permute.xlu1 %646 }
  0xb2   : > { %v652_v15 = vpop.permute.xlu0 %651 }
  0xb3   : > { %v657_v12 = vpop.permute.xlu1 %656 }
  0xfa   : > { %v978_v27 = vpop.f32.mrb[0].mxu0 }
  0xfb   : > { %v484_v28 = vadd.f32 %v978_v27, %v387_v26  ;;  %v478_v29 = vpop.f32.mrb[1].mxu0 }
  0xfc   : > { %v479_v30 = vadd.f32 %v478_v29, %v382_v24  ;;  %v765_v24 = vpop.permute.xlu0 %764 }
  0xfd   : > { %v498_v31 = vmax.f32 %v484_v28, 0.0 }
  0xfe   : > { %v497_v33 = vmax.f32 %v479_v30, 0.0  ;;  %v981_v34 = vpop.f32.mrb[2].mxu0 }
  0xff   : > { %v494_v35 = vadd.f32 %v981_v34, %v397_v32  ;;  %v488_v36 = vpop.f32.mrb[3].mxu0 }
 0x100   : > { %v489_v37 = vadd.f32 %v488_v36, %v392_v25  ;;  %v1025_v38 = vpack.c.bf16 %v498_v31, %v497_v33 }
 0x101   : > { %v500_v39 = vmax.f32 %v494_v35, 0.0 }
 0x102   : > { %v499_v40 = vmax.f32 %v489_v37, 0.0  ;;  %1026 = vmatprep.subr.bf16.mxu1 %v1025_v38 }
 0x103   : > { %1028 = vmatpush3.bf16.msra.mxu1 %v1025_v38 }
 0x104   : > { %v1029_v41 = vpack.c.bf16 %v500_v39, %v499_v40 }
 0x106   : > { %1030 = vmatprep.subr.bf16.mxu1 %v1029_v41 }
 0x107   : > { %1032 = vmatpush3.bf16.msra.mxu1 %v1029_v41 }
 0x108   : > { %1041 = vmatprep.subr.bf16.mxu1 %v1157_v3 }
 0x10a   : > { %991 = vmatmul.mubr.msk.f32.vlgmr.msra.gmra.mrb[0].mxu1 %vm529_vm1, %v502_v42 }
 0x10b   : > { %993 = vmatprep.mubr.msk.f32.mxu1 %vm529_vm1, %v503_v43 }
 0x10e   : > { %994 = vmatmul.mubr.msk.f32.gmra.mrb[2].mxu1 %vm529_vm1, %v504_v44 }
 0x10f   : > { %1018 = vmatprep.mubr.msk.f32.mxu1 %vm1158_vm2, %v1159_v4 }
 0x1dd   : > { %v992_v48 = vpop.f32.mrb[0].mxu1 }
 0x1de   : > { %v614_v49 = vadd.f32 %v992_v48, %v517_v46  ;;  %v608_v50 = vpop.f32.mrb[1].mxu1 }
 0x1df   : > { %v609_v51 = vadd.f32 %v608_v50, %v512_v47 }
 0x1e0   : > { %v628_v52 = vmax.f32 %v614_v49, 0.0 }
 0x1e1   : > { %v627_v54 = vmax.f32 %v609_v51, 0.0  ;;  %v995_v55 = vpop.f32.mrb[2].mxu1 }
 0x1e2   : > { %v624_v57 = vadd.f32 %v995_v55, %v527_v53  ;;  %v618_v58 = vpop.f32.mrb[3].mxu1 }
 0x1e3   : > { %v1033_v59 = vpack.c.bf16 %v628_v52, %v627_v54  ;;  %v619_v60 = vadd.f32 %v618_v58, %v522_v56 }
 0x1e4   : > { %v630_v61 = vmax.f32 %v624_v57, 0.0 }
 0x1e5   : > { %v629_v62 = vmax.f32 %v619_v60, 0.0  ;;  %1034 = vmatprep.subr.bf16.mxu0 %v1033_v59 }
 0x1e6   : > { %1036 = vmatpush3.bf16.msra.mxu0 %v1033_v59 }
 0x1e7   : > { %v1037_v63 = vpack.c.bf16 %v630_v61, %v629_v62 }
 0x1e9   : > { %1038 = vmatprep.subr.bf16.mxu0 %v1037_v63 }
 0x1ea   : > { %1040 = vmatpush3.bf16.msra.mxu0 %v1037_v63 }
 0x1ed   : > { %1005 = vmatmul.mubr.msk.f32.vlgmr.msra.gmra.mrb[4].mxu0 %vm529_vm1, %v632_v0 }
 0x1ee   : > { %1007 = vmatprep.mubr.msk.f32.mxu0 %vm529_vm1, %v633_v1 }
 0x1f1   : > { %1008 = vmatmul.mubr.msk.f32.gmra.mrb[6].mxu0 %vm529_vm1, %v634_v2 }
 0x2c0   : > { %v1006_v7 = vpop.f32.mrb[4].mxu0 }
 0x2c1   : > { %v743_v8 = vadd.f32 %v1006_v7, %v647_v5  ;;  %v737_v9 = vpop.f32.mrb[5].mxu0 }
 0x2c2   : > { %v738_v10 = vadd.f32 %v737_v9, %v642_v6 }
 0x2c3   : > { %v757_v11 = vmax.f32 %v743_v8, 0.0 }
 0x2c4   : > { %v756_v13 = vmax.f32 %v738_v10, 0.0  ;;  %v1009_v14 = vpop.f32.mrb[6].mxu0 }
 0x2c5   : > { %v753_v16 = vadd.f32 %v1009_v14, %v657_v12  ;;  %v747_v17 = vpop.f32.mrb[7].mxu0 }
 0x2c6   : > { %v1042_v18 = vpack.c.bf16 %v757_v11, %v756_v13  ;;  %v748_v19 = vadd.f32 %v747_v17, %v652_v15 }
 0x2c7   : > { %v759_v20 = vmax.f32 %v753_v16, 0.0 }
 0x2c8   : > { %v758_v21 = vmax.f32 %v748_v19, 0.0  ;;  %1043 = vmatpush3.bf16.msra.mxu1 %v1042_v18 }
 0x2c9   : > { %1044 = vmatprep.subr.bf16.mxu1 %v1157_v3 }
 0x2ca   : > { %v1045_v22 = vpack.c.bf16 %v759_v20, %v758_v21 }
 0x2cc   : > { %1046 = vmatpush3.bf16.msra.mxu1 %v1045_v22 }
 0x2cf   : > { %1019 = vmatmul.mubr.msk.f32.vlgmr.msra.gmra.mrb[4].mxu1 %vm529_vm1, %v760_v23 }
 0x3a2   : > { %v836_v25 = vpop.f32.mrb[4].mxu1 }
 0x3a3   : > { %v837_v26 = vadd.f32 %v836_v25, %v765_v24  ;;  %v1020_v27 = vpop.f32.mrb[5].mxu1 }
 0x3a5   : > { %840 = vst [vmem:[%s368_s14] sm:$0xff] %v837_v26 }
 0x3a6   : > { %1105 = shalt.err (!%p1102_p5)
}
 0x3a7   : > { %s1106_s28 = scalar_lea.hbm %s1368_s22, 128  ;;  %s1110_s14 = scalar_lea.hbm %s1421_s9, 256 }
 0x3a8   : > { %p1107_p7 = scmp.ne.s32.totalorder %s1368_s22, %s1106_s28  ;;  %p1111_p12 = scmp.lt.u32.totalorder %s1368_s22, %s1421_s9 }
 0x3a9   : > { %p1112_p13 = scmp.lt.u32.totalorder %s1110_s14, %s1106_s28  ;;  %p1114_p1 = scmp.lt.u32.totalorder %s1106_s28, %s1368_s22 }
 0x3aa   : > { %p1108_p10 = pnand %p1107_p7, %p1249_p6 }
 0x3ab   : > { %p1113_p0 = por %p1112_p13, %p1111_p12 }
 0x3ac   : > { %p1109_p11 = pneg %p1108_p10 }
 0x3ad   : > { %p1115_p2 = por %p1114_p1, %p1113_p0 }
 0x3af   : > { %p1116_p3 = pnand %p1115_p2, %p1109_p11 }
 0x3b1   : > { %1119 = shalt.err (!%p1116_p3)
}
 0x3b2   : > { %1047 = dma.vmem_to_hbm [thread:$0]  (%p1249_p6), %s1370_s17, 128, %s1368_s22, %s842_s23  }
 0x3b3 PF: > { %s867_s24 = sand.u32 1, %s1142_s30   ;;  %p1050_p4 = pnand %p922_p9, %p1253_p8 }
 0x3b4   : > { %s868_s13 = scalar_lea.sflag [#allocation4], %s867_s24 }
 0x3b5   : > { %1137 = dma.done.wait (!%p1050_p4), %s868_s13, 128  }
 0x3b6   : > { %1139 = vsyncadd (!%p1050_p4), %s868_s13, 4294967168  ;;  %p19_p5 = scmp.ge.s32.totalorder %s1234_s15, 4   ;;  %s1424_s30 = smov %s1146_s10 }
 0x3b7   : > { %s1425_s10 = smov %s1150_s11  ;;  %s1426_s11 = smov %s1247_s18 }
 0x3b8   : > { %s1427_s12 = smov %s1234_s15  ;;  %21 = sbr.rel (!%p19_p5) target bundleno = 3 (0x3), region = 134 }
 0x3bf   :  { %873 = vsyncpa [#allocation4], 1 }
 0x3c0   :  { %875 = vsyncpa [#allocation4 + $0x1], 1 }

</bundles_post_ra>
